<compile_context>
chip_gen: v6e
topology: v6e:2x2x1
jax: 0.10.0
libtpu: 0.0.40
codegen_flags: <defaults>
</compile_context>

<pallas_src>
import functools

import numpy as np
import jax
import jax.numpy as jnp
from jax import lax
from jax.experimental import pallas as pl
from jax.experimental.pallas import tpu as pltpu


_MAX_STATIC_UNROLL = 64          # static Python unroll cap for the fallback path
_VMEM_LIMIT_BYTES = 32 << 20     # safe on v5e/v6e (128 MiB phys) and v7x (64 MiB)


def _copy_block_kernel(x_ref, o_ref):
    # Strided path: BlockSpecs already selected the right depth slab.
    o_ref[...] = x_ref[...]


def _depth_sample_rows_kernel(x_ref, o_ref, *, stride, n_out, w):
    # Full-row path.  x_ref: (bc_block, D*W), o_ref: (bc_block, n_out*W).
    # Output columns [j*W, (j+1)*W) <- input columns [j*stride*W, j*stride*W + W).
    if n_out <= _MAX_STATIC_UNROLL:
        for j in range(n_out):                      # small n_out: static unroll
            src = j * stride * w
            o_ref[:, j * w:(j + 1) * w] = x_ref[:, src:src + w]
    else:
        # Large n_out: keep code size / store-slot pressure bounded.
        def body(j, carry):
            src = pl.multiple_of(j * (stride * w), w)
            dst = pl.multiple_of(j * w, w)
            o_ref[:, pl.ds(dst, w)] = x_ref[:, pl.ds(src, w)]
            return carry
        lax.fori_loop(0, n_out, body, 0)


def _choose_bc_block(bc, row_bytes, *, budget_bytes=4 << 20,
                     min_block_bytes=512 << 10, target_steps=4):
    """Block size along the fused B*C (sublane) axis.

    * multiple of 8 (tiling-legal) or equal to the full axis,
    * (in + out) block bytes <= budget_bytes, so the double-buffered footprint
      stays well under the default scoped-VMEM limit on v5e/v6e/v7x,
    * prefer an even grid-step count >= target_steps (v7x: two TensorCores,
      each with >= 2 pipelined steps), but never shrink a block below
      ~min_block_bytes (per-step overhead would dominate).
    No divisor constraint: the grid uses cdiv and Pallas clips the ragged
    last block.
    """
    if bc <= 8:
        return bc
    cap = max(8, (budget_bytes // max(1, row_bytes)) // 8 * 8)
    block = bc if cap >= bc else cap          # full axis, or a multiple of 8

    # Largest multiple-of-8 block giving an even step count >= target_steps
    # while staying >= min_block_bytes.
    b = min(cap, (bc // 8) * 8)
    while b >= 8 and b * row_bytes >= min_block_bytes:
        steps = -(-bc // b)
        if steps >= target_steps and steps % 2 == 0:
            return b
        b -= 8
    return block


def basic_depth_sampler(x, num_slices):
    """JAX/Pallas equivalent of BasicDepthSampler(num_slices)(x).

    x: (B, C, D, W) array.  Returns x[:, :, ::ceil(D / num_slices)].
    """
    B, C, D, W = x.shape
    stride = max(int(np.ceil(D / num_slices)), 1)
    n_out = -(-D // stride)                     # = len(range(0, D, stride))

    if stride == 1:                             # identity: no HBM pass at all
        return x

    BC = B * C
    itemsize = jnp.dtype(x.dtype).itemsize
    xf = x.reshape(BC, D * W)                   # free reshape, no data movement

    # Strided path needs a lane-tiled block (W % 128 == 0) and DMA-friendly
    # per-row slabs (>= ~512 B); otherwise fall back to full-row copies.
    use_strided = (W % 128 == 0) and (W * itemsize >= 512)

    if use_strided:
        # Minimal HBM traffic: only the surviving depth slabs are DMA'd.
        row_bytes = 2 * W * itemsize            # in + out bytes per fused row/step
        bc_block = _choose_bc_block(BC, row_bytes)
        grid = (pl.cdiv(BC, bc_block), n_out)
        bytes_accessed = 2 * BC * n_out * W * itemsize
        out_flat = pl.pallas_call(
            _copy_block_kernel,
            out_shape=jax.ShapeDtypeStruct((BC, n_out * W), x.dtype),
            grid=grid,
            in_specs=[pl.BlockSpec((bc_block, W), lambda i, j: (i, j * stride))],
            out_specs=pl.BlockSpec((bc_block, W), lambda i, j: (i, j)),
            compiler_params=pltpu.CompilerParams(
                dimension_semantics=("parallel", "parallel"),
                vmem_limit_bytes=_VMEM_LIMIT_BYTES),
            cost_estimate=pl.CostEstimate(flops=0, transcendentals=0,
                                          bytes_accessed=bytes_accessed),
        )(xf)
    else:
        # Full-row path: contiguous lane-dense DMAs; bounded over-read of the
        # skipped depth slabs (acceptable for small W where per-slab DMAs
        # would be tiny).
        row_bytes = (D + n_out) * W * itemsize
        bc_block = _choose_bc_block(BC, row_bytes)
        grid = (pl.cdiv(BC, bc_block),)
        kernel = functools.partial(_depth_sample_rows_kernel,
                                   stride=stride, n_out=n_out, w=W)
        bytes_accessed = BC * (D + n_out) * W * itemsize
        out_flat = pl.pallas_call(
            kernel,
            out_shape=jax.ShapeDtypeStruct((BC, n_out * W), x.dtype),
            grid=grid,
            in_specs=[pl.BlockSpec((bc_block, D * W), lambda i: (i, 0))],
            out_specs=pl.BlockSpec((bc_block, n_out * W), lambda i: (i, 0)),
            compiler_params=pltpu.CompilerParams(
                dimension_semantics=("parallel",),
                vmem_limit_bytes=_VMEM_LIMIT_BYTES),
            cost_estimate=pl.CostEstimate(flops=0, transcendentals=0,
                                          bytes_accessed=bytes_accessed),
        )(xf)

    return out_flat.reshape(B, C, n_out, W)     # free reshape back


if __name__ == "__main__":
    key = jax.random.PRNGKey(0)
    k1, k2, k3 = jax.random.split(key, 3)

    # 1) Small-W fallback path (W=16): full-row copies.
    B, C, D, W = 2, 4, 16, 16
    num_slices = 4
    x = jax.random.normal(k1, (B, C, D, W), dtype=jnp.float32)
    out = jax.block_until_ready(basic_depth_sampler(x, num_slices))
    stride = int(np.ceil(D / num_slices))
    ref = x[:, :, ::stride]
    assert out.shape == ref.shape, (out.shape, ref.shape)
    assert jnp.allclose(out, ref), "mismatch (full-row path)"

    # 2) Lane-wide strided path (W=128, D not divisible by stride).
    B2, C2, D2, W2 = 2, 2, 15, 128
    num_slices2 = 4
    x2 = jax.random.normal(k2, (B2, C2, D2, W2), dtype=jnp.float32)
    out2 = jax.block_until_ready(basic_depth_sampler(x2, num_slices2))
    stride2 = int(np.ceil(D2 / num_slices2))
    ref2 = x2[:, :, ::stride2]
    assert out2.shape == ref2.shape, (out2.shape, ref2.shape)
    assert jnp.allclose(out2, ref2), "mismatch (strided path)"

    # 3) Identity fast path (num_slices >= D).
    x3 = jax.random.normal(k3, (1, 2, 8, 16), dtype=jnp.float32)
    out3 = jax.block_until_ready(basic_depth_sampler(x3, 16))
    assert jnp.allclose(out3, x3[:, :, ::1]), "mismatch (identity path)"

    print("KERNEL_OK")
</pallas_src>

<mosaic_0001>
module attributes {stable_mosaic.version = 11 : i64} {
  func.func @_depth_sample_rows_kernel(%arg0: i32, %arg1: memref<8x256xf32, #tpu.memory_space<vmem>>, %arg2: memref<8x64xf32, #tpu.memory_space<vmem>>) attributes {dimension_semantics = [#tpu.dimension_semantics<parallel>], iteration_bounds = array<i64: 1>, scalar_prefetch = 0 : i64, scratch_operands = 0 : i64, tpu.core_type = #tpu.core_type<tc>, window_params = [{transform_indices = @transform_0, window_bounds = array<i64: 8, 256>}, {transform_indices = @transform_1, window_bounds = array<i64: 8, 64>}]} {
    %c0 = arith.constant 0 : index
    %c0_0 = arith.constant 0 : index
    %0 = vector.load %arg1[%c0, %c0_0] : memref<8x256xf32, #tpu.memory_space<vmem>>, vector<8x16xf32>
    %c0_1 = arith.constant 0 : index
    %c0_2 = arith.constant 0 : index
    %1 = vector.load %arg2[%c0_1, %c0_2] : memref<8x64xf32, #tpu.memory_space<vmem>>, vector<8x16xf32>
    tpu.vector_store %arg2[%c0_1, %c0_2], %0 {strides = array<i32>} : memref<8x64xf32, #tpu.memory_space<vmem>>, vector<8x16xf32>,
    %c0_3 = arith.constant 0 : index
    %c64 = arith.constant 64 : index
    %2 = vector.load %arg1[%c0_3, %c64] : memref<8x256xf32, #tpu.memory_space<vmem>>, vector<8x16xf32>
    %c0_4 = arith.constant 0 : index
    %c16 = arith.constant 16 : index
    %3 = vector.load %arg2[%c0_4, %c16] : memref<8x64xf32, #tpu.memory_space<vmem>>, vector<8x16xf32>
    tpu.vector_store %arg2[%c0_4, %c16], %2 {strides = array<i32>} : memref<8x64xf32, #tpu.memory_space<vmem>>, vector<8x16xf32>,
    %c0_5 = arith.constant 0 : index
    %c128 = arith.constant 128 : index
    %4 = vector.load %arg1[%c0_5, %c128] : memref<8x256xf32, #tpu.memory_space<vmem>>, vector<8x16xf32>
    %c0_6 = arith.constant 0 : index
    %c32 = arith.constant 32 : index
    %5 = vector.load %arg2[%c0_6, %c32] : memref<8x64xf32, #tpu.memory_space<vmem>>, vector<8x16xf32>
    tpu.vector_store %arg2[%c0_6, %c32], %4 {strides = array<i32>} : memref<8x64xf32, #tpu.memory_space<vmem>>, vector<8x16xf32>,
    %c0_7 = arith.constant 0 : index
    %c192 = arith.constant 192 : index
    %6 = vector.load %arg1[%c0_7, %c192] : memref<8x256xf32, #tpu.memory_space<vmem>>, vector<8x16xf32>
    %c0_8 = arith.constant 0 : index
    %c48 = arith.constant 48 : index
    %7 = vector.load %arg2[%c0_8, %c48] : memref<8x64xf32, #tpu.memory_space<vmem>>, vector<8x16xf32>
    tpu.vector_store %arg2[%c0_8, %c48], %6 {strides = array<i32>} : memref<8x64xf32, #tpu.memory_space<vmem>>, vector<8x16xf32>,
    return
  }
  func.func @transform_0(%arg0: i32) -> (i32, i32) {
    %c0_i32 = arith.constant 0 : i32
    %c0_i32_0 = arith.constant 0 : i32
    return %arg0, %c0_i32 : i32, i32
  }
  func.func @transform_1(%arg0: i32) -> (i32, i32) {
    %c0_i32 = arith.constant 0 : i32
    %c0_i32_0 = arith.constant 0 : i32
    return %arg0, %c0_i32 : i32, i32
  }
}

</mosaic_0001>

<bundles_post_ra>
// kernel: tpu_custom_call.1
= control target key start
LH: loop header
LB: loop body
LE: loop exit
PB: predicated region body
PF: predicated region fallthrough
CT: control target
= control target key end

     0   :  { %6 = vsyncpa [#allocation3], 0  ;;  %s130_s0 = inlined_call_operand.hbm [shape: f32[8,256], index: 0, kind: input, shape index: {}]   ;;  %s131_s1 = inlined_call_operand.hbm [shape: f32[8,64], index: 1, kind: output, shape index: {}]  }
   0x1   :  { %7 = vsyncpa [#allocation4], 0  ;;  %s109_s6 = smov [#allocation2]  }
   0x2   :  { %s14_s7 = sshll.u32 %s109_s6, 4  ;;  %s15_s7 = int_to_ptr.vmem [resolvable:$true] %s14_s7 }
   0x3   :  { %s73_s8 = scalar_lea.vmem %s15_s7, 256  ;;  %p78_p1 = scmp.lt.s32.totalorder %s15_s7, %s15_s7 }
   0x4   :  { %p74_p0 = scmp.ne.s32.totalorder %s15_s7, %s73_s8  ;;  %p79_p2 = scmp.lt.s32.totalorder %s73_s8, %s73_s8 }
   0x6   :  { %p80_p3 = por %p79_p2, %p78_p1 }
   0x8   :  { %p81_p4 = pnand %p80_p3, %p74_p0 }
   0xa   :  { %84 = shalt.err (!%p81_p4)
}
   0xb   :  { %17 = dma.hbm_to_vmem [thread:$0]  %s130_s0, 256, %s15_s7, [#allocation3]  }
   0xc   :  { %105 = dma.done.wait [#allocation3], 256  }
   0xd   :  { %106 = vsyncadd [#allocation3], 4294967040  ;;  %vm22_vm0 = vcmask 130048   ;;  %v24_v0 = vld [vmem:[#allocation2] sm:$0xff]  ;;  %v31_v1 = vld [vmem:[#allocation2 + $0x8] sm:$0xff]  ;;  %s110_s11 = smov 80  }
   0xe   :  { %26 = vrot.lane.b32.xlu0 %v24_v0, %s110_s11  ;;  %s111_s12 = smov 112   ;;  %23 = vst.msk [vmem:[#allocation5] sm:$0xff] %vm22_vm0, %v24_v0  ;;  %s112_s13 = smov 32   ;;  %vm29_vm1 = vcmask 261248   ;;  %vm36_vm2 = vcmask 392448   ;;  %vm43_vm3 = vcmask 523648  }
   0xf   :  { %40 = vrot.lane.b32.xlu1 %v31_v1, %s111_s12  ;;  %s113_s14 = smov [#allocation5]  }
  0x10   :  { %s51_s15 = sshll.u32 %s113_s14, 4  ;;  %s52_s15 = int_to_ptr.vmem [resolvable:$true] %s51_s15 }
  0x11   :  { %s85_s0 = scalar_lea.vmem %s52_s15, 128  ;;  %p90_p6 = scmp.lt.s32.totalorder %s52_s15, %s52_s15 }
  0x12   :  { %33 = vrot.lane.b32.xlu0 %v31_v1, %s112_s13  ;;  %p86_p5 = scmp.ne.s32.totalorder %s52_s15, %s85_s0  ;;  %p91_p7 = scmp.lt.s32.totalorder %s85_s0, %s85_s0 }
  0x14   :  { %p92_p8 = por %p91_p7, %p90_p6 }
  0x16   :  { %p93_p9 = pnand %p92_p8, %p86_p5 }
  0x80   :  { %v27_v2 = vpop.permute.xlu0 %26 }
  0x81   :  { %30 = vst.msk [vmem:[#allocation5] sm:$0xff] %vm29_vm1, %v27_v2  ;;  %v41_v3 = vpop.permute.xlu1 %40 }
  0x84   :  { %v34_v4 = vpop.permute.xlu0 %33 }
  0x85   :  { %37 = vst.msk [vmem:[#allocation5] sm:$0xff] %vm36_vm2, %v34_v4 }
  0x86   :  { %44 = vst.msk [vmem:[#allocation5] sm:$0xff] %vm43_vm3, %v41_v3 }
  0x87   :  { %96 = shalt.err (!%p93_p9)
}
  0x88   :  { %54 = dma.vmem_to_hbm [thread:$0]  %s52_s15, 128, %s131_s1, [#allocation4]  }
  0x89   :  { %107 = dma.done.wait [#allocation4], 128  }
  0x8a   :  { %108 = vsyncadd [#allocation4], 4294967168 }
  0x8b   :  { %58 = vsyncpa [#allocation3], 1 }
  0x8c   :  { %59 = vsyncpa [#allocation4], 1 }

</bundles_post_ra>
